<compile_context>
chip_gen: v5e
topology: v5e:2x2
jax: 0.10.0
libtpu: 0.0.40
codegen_flags: <defaults>
</compile_context>

<pallas_src>
import functools

import jax
import jax.numpy as jnp
from jax.experimental import pallas as pl
from jax.experimental.pallas import tpu as pltpu


def _lds_kernel(input_s,
                target_ref, w1t_ref, b1_ref, w2t_ref, b2_ref,
                pcat_ref, r_ref, bm_ref,
                hidden_ref, act_ref):
    # ---- initial condition x0 = l2(relu(l1(target))), row layout (nT, h_s) --
    tgt = target_ref[...]                                  # (nT, input_s)
    w1t = w1t_ref[...]                                     # (input_s, h_nn_s)

    # Layer 1: K = input_s (tiny) -> VPU broadcast FMAs, skip the MXU round-trip.
    h1 = tgt[:, 0:1] * w1t[0:1, :]
    for i in range(1, input_s):
        h1 = h1 + tgt[:, i:i + 1] * w1t[i:i + 1, :]
    h1 = jnp.maximum(h1 + b1_ref[...], 0.0)                # (nT, h_nn_s)

    # Layer 2: K = h_nn_s (256) -> MXU.
    x0 = jnp.dot(h1, w2t_ref[...],
                 preferred_element_type=jnp.float32) + b2_ref[...]   # (nT, h_s)

    # ---- ALL hidden states with one matmul ----------------------------------
    # hidden[s] = M^s @ x0^T; pcat stacks M^0..M^{S-1} along rows, so the
    # result (S*h_s, nT) is already in the PyTorch (step, h_s, target) memory
    # order -> single store, no per-step serial chain.
    hidden_ref[...] = jnp.dot(pcat_ref[...], x0.T,
                              preferred_element_type=jnp.float32)

    # ---- ALL actions with one matmul + tanh ---------------------------------
    # r[:, a*S + s] = (M^s)^T @ wm[a, :], bm_slab[0, a*S + s] = bm[a], so the
    # result (nT, A*S) is already in the PyTorch (target, action, step) order.
    act_ref[...] = jnp.tanh(
        jnp.dot(x0, r_ref[...], preferred_element_type=jnp.float32)
        + bm_ref[...])


def prepare_params(params, *, t_step, n_steps):
    """One-time (per parameter set) folding of weights into kernel operands.

    Hoisted out of the per-forward path so each forward call issues exactly one
    pallas_call plus two metadata-only reshapes.
    """
    w1, b1 = params["w1"], params["b1"]
    w2, b2 = params["w2"], params["b2"]
    wm, bm = params["wm"], params["bm"]
    A = jnp.asarray(params["A"], jnp.float32)
    h_s = A.shape[0]
    action_s = wm.shape[0]

    # Fold t_step into the dynamics matrix and precompute its powers so the
    # serial recurrence collapses to one batched matmul inside the kernel.
    M = jnp.eye(h_s, dtype=jnp.float32) - jnp.float32(t_step) * A
    powers = [jnp.eye(h_s, dtype=jnp.float32)]
    for _ in range(1, n_steps):
        powers.append(M @ powers[-1])                      # powers[s] = M^s

    pcat = jnp.concatenate(powers, axis=0)                 # (S*h_s, h_s)

    # Folded readout: column (a*S + s) of r is (M^s)^T @ wm[a, :].
    wmt = jnp.asarray(wm, jnp.float32).T                   # (h_s, A)
    r_sha = jnp.stack([p.T @ wmt for p in powers], axis=0)  # (S, h_s, A)
    r = jnp.transpose(r_sha, (1, 2, 0)).reshape(h_s, action_s * n_steps)
    bm_slab = jnp.broadcast_to(
        jnp.asarray(bm, jnp.float32)[:, None], (action_s, n_steps)
    ).reshape(1, action_s * n_steps)

    return dict(
        w1t=jnp.asarray(w1, jnp.float32).T,
        b1=jnp.asarray(b1, jnp.float32).reshape(1, -1),
        w2t=jnp.asarray(w2, jnp.float32).T,
        b2=jnp.asarray(b2, jnp.float32).reshape(1, -1),
        pcat=pcat, r=r, bm=bm_slab,
        n_steps=int(n_steps), h_s=int(h_s), action_s=int(action_s),
    )


@functools.partial(jax.jit,
                   static_argnames=("n_steps", "h_s", "action_s", "input_s"))
def _forward_impl(target, w1t, b1, w2t, b2, pcat, r, bm, *,
                  n_steps, h_s, action_s, input_s):
    n_targets = target.shape[0]
    vmem = pl.BlockSpec(memory_space=pltpu.MemorySpace.VMEM)
    hidden_slab, act_slab = pl.pallas_call(
        functools.partial(_lds_kernel, input_s),
        out_shape=(
            jax.ShapeDtypeStruct((n_steps * h_s, n_targets), jnp.float32),
            jax.ShapeDtypeStruct((n_targets, action_s * n_steps), jnp.float32),
        ),
        in_specs=[vmem] * 8,
        out_specs=(vmem, vmem),
    )(target, w1t, b1, w2t, b2, pcat, r, bm)

    # Contiguous reshapes only (bitcasts): the kernel already produced the
    # PyTorch memory order for both outputs -> no wrapper-side transposes.
    hidden = hidden_slab.reshape(n_steps, h_s, n_targets)
    actions = act_slab.reshape(n_targets, action_s, n_steps)
    return actions, hidden


def complex_linear_ds_forward(target, prepared):
    target = jnp.asarray(target, jnp.float32)
    return _forward_impl(
        target,
        prepared["w1t"], prepared["b1"], prepared["w2t"], prepared["b2"],
        prepared["pcat"], prepared["r"], prepared["bm"],
        n_steps=prepared["n_steps"], h_s=prepared["h_s"],
        action_s=prepared["action_s"], input_s=int(target.shape[1]),
    )


def reference_forward(target, params, *, t_step, n_steps):
    """Pure-JAX reference mirroring the PyTorch module exactly."""
    w1, b1 = params["w1"], params["b1"]
    w2, b2 = params["w2"], params["b2"]
    wm, bm = params["wm"], params["bm"]
    A = params["A"]

    h1 = jax.nn.relu(target @ w1.T + b1)
    x = (h1 @ w2.T + b2).T                       # (h_s, n_targets)
    hs, acts = [], []
    for _ in range(n_steps):
        hs.append(x)
        acts.append(jnp.tanh(x.T @ wm.T + bm))   # (n_targets, action_s)
        x = x - (A @ x) * t_step
    hidden = jnp.stack(hs, axis=0)                           # (n_steps, h_s, n_targets)
    actions = jnp.transpose(jnp.stack(acts, 0), (1, 2, 0))   # (n_targets, action_s, n_steps)
    return actions, hidden


if __name__ == "__main__":
    # Small shapes consistent with the module's __init__ defaults.
    n_targets, input_s, h_nn_s, h_s, action_s = 8, 2, 256, 10, 2
    n_steps, t_step = 8, 0.1

    key = jax.random.PRNGKey(0)
    ks = jax.random.split(key, 8)
    params = {
        "A":  jax.random.normal(ks[0], (h_s, h_s), jnp.float32) * 0.1,
        "w1": jax.random.normal(ks[1], (h_nn_s, input_s), jnp.float32) * 0.1,
        "b1": jax.random.normal(ks[2], (h_nn_s,), jnp.float32) * 0.1,
        "w2": jax.random.normal(ks[3], (h_s, h_nn_s), jnp.float32) * 0.1,
        "b2": jax.random.normal(ks[4], (h_s,), jnp.float32) * 0.1,
        "wm": jax.random.normal(ks[5], (action_s, h_s), jnp.float32) * 0.1,
        "bm": jax.random.normal(ks[6], (action_s,), jnp.float32) * 0.1,
    }
    target = jax.random.normal(ks[7], (n_targets, input_s), jnp.float32)

    # One-time parameter folding (cache & reuse across forward calls).
    prepared = prepare_params(params, t_step=t_step, n_steps=n_steps)

    actions, hidden = complex_linear_ds_forward(target, prepared)
    jax.block_until_ready((actions, hidden))

    ref_actions, ref_hidden = reference_forward(
        target, params, t_step=t_step, n_steps=n_steps)

    assert actions.shape == (n_targets, action_s, n_steps), actions.shape
    assert hidden.shape == (n_steps, h_s, n_targets), hidden.shape
    assert jnp.allclose(actions, ref_actions, atol=1e-5, rtol=1e-4)
    assert jnp.allclose(hidden, ref_hidden, atol=1e-5, rtol=1e-4)

    print("KERNEL_OK")
</pallas_src>

<mosaic_0001>
module attributes {stable_mosaic.version = 11 : i64} {
  func.func @_lds_kernel(%arg0: memref<8x2xf32, #tpu.memory_space<vmem>>, %arg1: memref<2x256xf32, #tpu.memory_space<vmem>>, %arg2: memref<1x256xf32, #tpu.memory_space<vmem>>, %arg3: memref<256x10xf32, #tpu.memory_space<vmem>>, %arg4: memref<1x10xf32, #tpu.memory_space<vmem>>, %arg5: memref<80x10xf32, #tpu.memory_space<vmem>>, %arg6: memref<10x16xf32, #tpu.memory_space<vmem>>, %arg7: memref<1x16xf32, #tpu.memory_space<vmem>>, %arg8: memref<80x8xf32, #tpu.memory_space<vmem>>, %arg9: memref<8x16xf32, #tpu.memory_space<vmem>>) attributes {dimension_semantics = [], scalar_prefetch = 0 : i64, scratch_operands = 0 : i64, tpu.core_type = #tpu.core_type<tc>} {
    %c0 = arith.constant 0 : index
    %c0_0 = arith.constant 0 : index
    %0 = vector.load %arg0[%c0, %c0_0] : memref<8x2xf32, #tpu.memory_space<vmem>>, vector<8x2xf32>
    %c0_1 = arith.constant 0 : index
    %c0_2 = arith.constant 0 : index
    %1 = vector.load %arg1[%c0_1, %c0_2] : memref<2x256xf32, #tpu.memory_space<vmem>>, vector<2x256xf32>
    %2 = vector.extract_strided_slice %0 {offsets = [0, 0], sizes = [8, 1], strides = [1, 1]} : vector<8x2xf32> to vector<8x1xf32>
    %3 = vector.extract_strided_slice %1 {offsets = [0, 0], sizes = [1, 256], strides = [1, 1]} : vector<2x256xf32> to vector<1x256xf32>
    %4 = vector.broadcast %2 : vector<8x1xf32> to vector<8x256xf32>
    %5 = vector.broadcast %3 : vector<1x256xf32> to vector<8x256xf32>
    %6 = arith.mulf %4, %5 : vector<8x256xf32>
    %7 = vector.extract_strided_slice %0 {offsets = [0, 1], sizes = [8, 1], strides = [1, 1]} : vector<8x2xf32> to vector<8x1xf32>
    %8 = vector.extract_strided_slice %1 {offsets = [1, 0], sizes = [1, 256], strides = [1, 1]} : vector<2x256xf32> to vector<1x256xf32>
    %9 = vector.broadcast %7 : vector<8x1xf32> to vector<8x256xf32>
    %10 = vector.broadcast %8 : vector<1x256xf32> to vector<8x256xf32>
    %11 = arith.mulf %9, %10 : vector<8x256xf32>
    %12 = arith.addf %6, %11 : vector<8x256xf32>
    %c0_3 = arith.constant 0 : index
    %c0_4 = arith.constant 0 : index
    %13 = vector.load %arg2[%c0_3, %c0_4] : memref<1x256xf32, #tpu.memory_space<vmem>>, vector<1x256xf32>
    %14 = vector.broadcast %13 : vector<1x256xf32> to vector<8x256xf32>
    %15 = arith.addf %12, %14 : vector<8x256xf32>
    %cst = arith.constant 0.000000e+00 : f32
    %16 = vector.broadcast %cst : f32 to vector<8x256xf32>
    %17 = arith.maximumf %15, %16 : vector<8x256xf32>
    %c0_5 = arith.constant 0 : index
    %c0_6 = arith.constant 0 : index
    %18 = vector.load %arg3[%c0_5, %c0_6] : memref<256x10xf32, #tpu.memory_space<vmem>>, vector<256x10xf32>
    %cst_7 = arith.constant dense<0.000000e+00> : vector<8x10xf32>
    %19 = tpu.matmul %17, %18, %cst_7 {dimension_numbers = #tpu.dot_dimension_numbers<[1], [0], [0], [1], [0, 0, 1, 1], [], []>} : vector<8x256xf32>, vector<256x10xf32>, vector<8x10xf32> -> vector<8x10xf32>
    %c0_8 = arith.constant 0 : index
    %c0_9 = arith.constant 0 : index
    %20 = vector.load %arg4[%c0_8, %c0_9] : memref<1x10xf32, #tpu.memory_space<vmem>>, vector<1x10xf32>
    %21 = vector.broadcast %20 : vector<1x10xf32> to vector<8x10xf32>
    %22 = arith.addf %19, %21 : vector<8x10xf32>
    %c0_10 = arith.constant 0 : index
    %c0_11 = arith.constant 0 : index
    %23 = vector.load %arg5[%c0_10, %c0_11] : memref<80x10xf32, #tpu.memory_space<vmem>>, vector<80x10xf32>
    %24 = tpu.transpose %22, [1, 0] : vector<8x10xf32> -> vector<10x8xf32>
    %cst_12 = arith.constant dense<0.000000e+00> : vector<80x8xf32>
    %25 = tpu.matmul %23, %24, %cst_12 {dimension_numbers = #tpu.dot_dimension_numbers<[1], [0], [0], [1], [0, 0, 1, 1], [], []>} : vector<80x10xf32>, vector<10x8xf32>, vector<80x8xf32> -> vector<80x8xf32>
    %c0_13 = arith.constant 0 : index
    %c0_14 = arith.constant 0 : index
    %26 = vector.load %arg8[%c0_13, %c0_14] : memref<80x8xf32, #tpu.memory_space<vmem>>, vector<80x8xf32>
    tpu.vector_store %arg8[%c0_13, %c0_14], %25 {strides = array<i32>} : memref<80x8xf32, #tpu.memory_space<vmem>>, vector<80x8xf32>,
    %c0_15 = arith.constant 0 : index
    %c0_16 = arith.constant 0 : index
    %27 = vector.load %arg6[%c0_15, %c0_16] : memref<10x16xf32, #tpu.memory_space<vmem>>, vector<10x16xf32>
    %cst_17 = arith.constant dense<0.000000e+00> : vector<8x16xf32>
    %28 = tpu.matmul %22, %27, %cst_17 {dimension_numbers = #tpu.dot_dimension_numbers<[1], [0], [0], [1], [0, 0, 1, 1], [], []>} : vector<8x10xf32>, vector<10x16xf32>, vector<8x16xf32> -> vector<8x16xf32>
    %c0_18 = arith.constant 0 : index
    %c0_19 = arith.constant 0 : index
    %29 = vector.load %arg7[%c0_18, %c0_19] : memref<1x16xf32, #tpu.memory_space<vmem>>, vector<1x16xf32>
    %30 = vector.broadcast %29 : vector<1x16xf32> to vector<8x16xf32>
    %31 = arith.addf %28, %30 : vector<8x16xf32>
    %32 = math.tanh %31 : vector<8x16xf32>
    %c0_20 = arith.constant 0 : index
    %c0_21 = arith.constant 0 : index
    %33 = vector.load %arg9[%c0_20, %c0_21] : memref<8x16xf32, #tpu.memory_space<vmem>>, vector<8x16xf32>
    tpu.vector_store %arg9[%c0_20, %c0_21], %32 {strides = array<i32>} : memref<8x16xf32, #tpu.memory_space<vmem>>, vector<8x16xf32>,
    return
  }
}

</mosaic_0001>

<bundles_post_ra>
// kernel: _forward_impl.1
= control target key start
LH: loop header
LB: loop body
LE: loop exit
PB: predicated region body
PF: predicated region fallthrough
CT: control target
= control target key end

     0   :  { %v313_v0 = vmov 0   ;;  %v314_v13 = vmov 1   ;;  %vm157_vm0 = vcmask 80896   ;;  %vm255_vm1 = vcmask 1041408   ;;  %s569_s0 = inlined_call_operand.vmem [shape: f32[8,2], index: 0, kind: input, shape index: {}]   ;;  %s570_s3 = inlined_call_operand.vmem [shape: f32[256,10], index: 3, kind: input, shape index: {}]   ;;  %s571_s4 = inlined_call_operand.vmem [shape: f32[1,10], index: 4, kind: input, shape index: {}]   ;;  %s572_s1 = inlined_call_operand.vmem [shape: f32[2,256], index: 1, kind: input, shape index: {}]   ;;  %s573_s2 = inlined_call_operand.vmem [shape: f32[1,256], index: 2, kind: input, shape index: {}]   ;;  %s574_s6 = inlined_call_operand.vmem [shape: f32[10,16], index: 6, kind: input, shape index: {}]   ;;  %s575_s5 = inlined_call_operand.vmem [shape: f32[80,10], index: 5, kind: input, shape index: {}]   ;;  %s576_s7 = inlined_call_operand.vmem [shape: f32[1,16], index: 7, kind: input, shape index: {}]   ;;  %s577_s8 = inlined_call_operand.vmem [shape: f32[80,8], index: 8, kind: output, shape index: {0}]   ;;  %s578_s9 = inlined_call_operand.vmem [shape: f32[8,16], index: 9, kind: output, shape index: {1}]  }
   0x1   :  { %307 = vset.pattern.permute.xlu0 %v313_v0  ;;  %v31_v1 = vld [vmem:[%s569_s0] sm:$0xff]  ;;  %v86_v2 = vld [vmem:[%s570_s3 + $0x78] sm:$0xff]  ;;  %v85_v4 = vld [vmem:[%s570_s3 + $0x70] sm:$0xff]  ;;  %vm238_vm2 = vcmask 64512   ;;  %vm280_vm3 = vcmask 130048  }
   0x2   :  { %v102_v3 = vld [vmem:[%s570_s3 + $0xf8] sm:$0xff]  ;;  %35 = vperm.xlu0 %307, %v31_v1   ;;  %107 = vmatpush.msra.mxu0 %v86_v2  ;;  %v101_v5 = vld [vmem:[%s570_s3 + $0xf0] sm:$0xff]  ;;  %v84_v6 = vld [vmem:[%s570_s3 + $0x68] sm:$0xff] }
   0x3   :  { %127 = vmatpush.msra.mxu1 %v102_v3  ;;  %v100_v7 = vld [vmem:[%s570_s3 + $0xe8] sm:$0xff]  ;;  %v83_v8 = vld [vmem:[%s570_s3 + $0x60] sm:$0xff]  ;;  %v82_v10 = vld [vmem:[%s570_s3 + $0x58] sm:$0xff] }
   0x4   :  { %108 = vmatpush.msra.mxu0 %v85_v4  ;;  %v99_v9 = vld [vmem:[%s570_s3 + $0xe0] sm:$0xff]  ;;  %v98_v11 = vld [vmem:[%s570_s3 + $0xd8] sm:$0xff]  ;;  %v81_v12 = vld [vmem:[%s570_s3 + $0x50] sm:$0xff] }
   0x5   :  { %128 = vmatpush.msra.mxu1 %v101_v5  ;;  %v97_v14 = vld [vmem:[%s570_s3 + $0xd0] sm:$0xff]  ;;  %v80_v15 = vld [vmem:[%s570_s3 + $0x48] sm:$0xff]  ;;  %v79_v17 = vld [vmem:[%s570_s3 + $0x40] sm:$0xff] }
   0x6   :  { %109 = vmatpush.msra.mxu0 %v84_v6  ;;  %v96_v16 = vld [vmem:[%s570_s3 + $0xc8] sm:$0xff]  ;;  %v95_v18 = vld [vmem:[%s570_s3 + $0xc0] sm:$0xff]  ;;  %v78_v19 = vld [vmem:[%s570_s3 + $0x38] sm:$0xff] }
   0x7   :  { %129 = vmatpush.msra.mxu1 %v100_v7  ;;  %v94_v20 = vld [vmem:[%s570_s3 + $0xb8] sm:$0xff]  ;;  %v77_v21 = vld [vmem:[%s570_s3 + $0x30] sm:$0xff]  ;;  %v76_v23 = vld [vmem:[%s570_s3 + $0x28] sm:$0xff] }
   0x8   :  { %110 = vmatpush.msra.mxu0 %v83_v8  ;;  %v93_v22 = vld [vmem:[%s570_s3 + $0xb0] sm:$0xff]  ;;  %v92_v24 = vld [vmem:[%s570_s3 + $0xa8] sm:$0xff]  ;;  %v75_v25 = vld [vmem:[%s570_s3 + $0x20] sm:$0xff] }
   0x9   :  { %130 = vmatpush.msra.mxu1 %v99_v9  ;;  %v91_v26 = vld [vmem:[%s570_s3 + $0xa0] sm:$0xff]  ;;  %v74_v27 = vld [vmem:[%s570_s3 + $0x18] sm:$0xff]  ;;  %v73_v29 = vld [vmem:[%s570_s3 + $0x10] sm:$0xff] }
   0xa   :  { %308 = vset.pattern.permute.xlu0 %v314_v13  ;;  %111 = vmatpush.msra.mxu0 %v82_v10  ;;  %v90_v28 = vld [vmem:[%s570_s3 + $0x98] sm:$0xff]  ;;  %v89_v30 = vld [vmem:[%s570_s3 + $0x90] sm:$0xff]  ;;  %v72_v31 = vld [vmem:[%s570_s3 + $0x8] sm:$0xff] }
   0xb   :  { %48 = vperm.xlu0 %308, %v31_v1   ;;  %131 = vmatpush.msra.mxu1 %v98_v11  ;;  %v88_v32 = vld [vmem:[%s570_s3 + $0x88] sm:$0xff]  ;;  %v71_v33 = vld [vmem:[%s570_s3] sm:$0xff]  ;;  %v153_v2 = vld [vmem:[%s575_s5 + $0x30] sm:$0xff] }
   0xc   :  { %112 = vmatpush.msra.mxu0 %v81_v12  ;;  %v87_v34 = vld [vmem:[%s570_s3 + $0x80] sm:$0xff]  ;;  %v250_v0 = vld [vmem:[%s574_s6 + $0x8] sm:$0x3]  ;;  %v149_v5 = vld [vmem:[%s575_s5 + $0x10] sm:$0xff] }
   0xd   :  { %132 = vmatpush.msra.mxu1 %v97_v14  ;;  %v32_v35 = vld [vmem:[%s572_s1] sm:$0xf]  ;;  %v148_v1 = vld [vmem:[%s575_s5 + $0x8] sm:$0xff]  ;;  %v154_v6 = vld [vmem:[%s575_s5 + $0x38] sm:$0xff] }
   0xe   :  { %113 = vmatpush.msra.mxu0 %v80_v15  ;;  %v39_v37 = vperm.slane %v32_v35, 0  ;;  %v40_v38 = vperm.slane %v32_v35, 2  ;;  %v51_v39 = vperm.slane %v32_v35, 1  ;;  %v52_v40 = vperm.slane %v32_v35, 3  ;;  %v61_v45 = vld [vmem:[%s573_s2] sm:$0x3] }
   0xf   :  { %133 = vmatpush.msra.mxu1 %v96_v16  ;;  %v63_v47 = vperm.slane %v61_v45, 0  ;;  %v64_v48 = vperm.slane %v61_v45, 1  ;;  %v309_v59 = vld [vmem:[%s571_s4] ss:$0 sm:$0xff]  ;;  %v150_v7 = vld [vmem:[%s575_s5 + $0x18] sm:$0xff]  ;;  %v156_v10 = vld [vmem:[%s575_s5 + $0x48] sm:$0xff] }
  0x10   :  { %114 = vmatpush.msra.mxu0 %v79_v17  ;;  %v43_v41 = vperm.slane %v39_v37, 0  ;;  %v44_v42 = vperm.slane %v40_v38, 0  ;;  %v55_v43 = vperm.slane %v51_v39, 1  ;;  %v56_v44 = vperm.slane %v52_v40, 1  ;;  %v249_v3 = vld [vmem:[%s574_s6] sm:$0xff]  ;;  %v152_v11 = vld [vmem:[%s575_s5 + $0x28] sm:$0xff] }
  0x11   :  { %134 = vmatpush.msra.mxu1 %v95_v18  ;;  %v147_v4 = vld [vmem:[%s575_s5] sm:$0xff] }
  0x12   :  { %115 = vmatpush.msra.mxu0 %v78_v19  ;;  %v155_v8 = vld [vmem:[%s575_s5 + $0x40] sm:$0xff] }
  0x13   :  { %135 = vmatpush.msra.mxu1 %v94_v20  ;;  %v151_v9 = vld [vmem:[%s575_s5 + $0x20] sm:$0xff] }
  0x14   :  { %116 = vmatpush.msra.mxu0 %v77_v21  ;;  %v310_v21 = vld [vmem:[%s576_s7] ss:$0 sm:$0xff] }
  0x15   :  { %136 = vmatpush.msra.mxu1 %v93_v22 }
  0x16   :  { %117 = vmatpush.msra.mxu0 %v76_v23 }
  0x17   :  { %137 = vmatpush.msra.mxu1 %v92_v24 }
  0x18   :  { %118 = vmatpush.msra.mxu0 %v75_v25 }
  0x19   :  { %138 = vmatpush.msra.mxu1 %v91_v26 }
  0x1a   :  { %119 = vmatpush.msra.mxu0 %v74_v27 }
  0x1b   :  { %139 = vmatpush.msra.mxu1 %v90_v28 }
  0x1c   :  { %120 = vmatpush.msra.mxu0 %v73_v29 }
  0x1d   :  { %140 = vmatpush.msra.mxu1 %v89_v30 }
  0x1e   :  { %121 = vmatpush.msra.mxu0 %v72_v31 }
  0x1f   :  { %141 = vmatpush.msra.mxu1 %v88_v32 }
  0x20   :  { %122 = vmatpush.msra.mxu0 %v71_v33 }
  0x21   :  { %142 = vmatpush.msra.mxu1 %v87_v34 }
  0x74   :  { %v36_v36 = vpop.permute.xlu0 %35 }
  0x75   :  { %v45_v49 = vmul.f32 %v43_v41, %v36_v36  ;;  %v46_v50 = vmul.f32 %v44_v42, %v36_v36 }
  0x7d   :  { %v49_v46 = vpop.permute.xlu0 %48 }
  0x7e   :  { %v57_v51 = vmul.f32 %v55_v43, %v49_v46  ;;  %v58_v52 = vmul.f32 %v56_v44, %v49_v46 }
  0x80   :  { %v59_v53 = vadd.f32 %v57_v51, %v45_v49  ;;  %v60_v54 = vadd.f32 %v58_v52, %v46_v50 }
  0x82   :  { %v67_v55 = vadd.f32 %v63_v47, %v59_v53  ;;  %v68_v56 = vadd.f32 %v64_v48, %v60_v54 }
  0x84   :  { %v69_v57 = vmax.f32 %v67_v55, 0.0  ;;  %v70_v58 = vmax.f32 %v68_v56, 0.0 }
  0x86   :  { %123 = vmatmul.f32.vlgmr.msra.gmra.mxu0 %v69_v57  ;;  %143 = vmatmul.f32.vlgmr.msra.gmra.mxu1 %v70_v58 }
 0x103   :  { %v124_v60 = vpop.f32.mrf.mxu0  ;;  %v144_v62 = vpop.f32.mrf.mxu1 }
 0x104   :  { %v125_v61 = vadd.f32 %v309_v59, %v124_v60 }
 0x106   :  { %v145_v63 = vadd.f32 %v144_v62, %v125_v61 }
 0x108   :  { %290 = vmatpush.xpose.msk.msrb.mxu0 %vm157_vm0, %v145_v63  ;;  %303 = vmatpush.xpose.msk.msra.mxu2 %vm157_vm0, %v145_v63 }
 0x109   :  { %304 = vmatpush.xpose.msk.msra.mxu3 %vm157_vm0, %v145_v63 }
 0x10b   :  { %292 = vmatmul.msk.f32.vlgmr.msra.gmra.mxu2 %vm157_vm0, %v148_v1  ;;  %291 = vmatmul.msk.f32.vlgmr.msrb.gmra.mxu0 %vm157_vm0, %v147_v4 }
 0x10c   :  { %297 = vmatmul.msk.f32.vlgmr.msra.gmra.mxu3 %vm157_vm0, %v153_v2 }
 0x10d   :  { %301 = vmatpush.msk.msrb.mxu3 %vm255_vm1, %v250_v0 }
 0x10f   :  { %274 = vmatpush.msrb.mxu3 %v249_v3 }
 0x113   :  { %293 = vmatmul.msk.f32.gmra.mxu2 %vm157_vm0, %v149_v5 }
 0x114   :  { %298 = vmatmul.msk.f32.gmra.mxu3 %vm157_vm0, %v154_v6 }
 0x11b   :  { %294 = vmatmul.msk.f32.gmra.mxu2 %vm157_vm0, %v150_v7 }
 0x11c   :  { %299 = vmatmul.msk.f32.gmra.mxu3 %vm157_vm0, %v155_v8 }
 0x123   :  { %295 = vmatmul.msk.f32.gmra.mxu2 %vm157_vm0, %v151_v9 }
 0x124   :  { %300 = vmatmul.msk.f32.gmra.mxu3 %vm157_vm0, %v156_v10 }
 0x12b   :  { %296 = vmatmul.msk.f32.gmra.mxu2 %vm157_vm0, %v152_v11 }
 0x12c   :  { %302 = vmatmul.msk.f32.vlgmr.msrb.gmra.mxu3 %vm157_vm0, %v145_v63 }
 0x188   :  { %v208_v16 = vpop.f32.mrf.mxu0 }
 0x189   :  { %239 = vst.msk [vmem:[%s577_s8] sm:$0xff] %vm238_vm2, %v208_v16 }
 0x18e   :  { %v211_v12 = vpop.f32.mrf.mxu2 }
 0x18f   :  { %v226_v13 = vpop.f32.mrf.mxu3  ;;  %240 = vst.msk [vmem:[%s577_s8 + $0x8] sm:$0xff] %vm238_vm2, %v211_v12 }
 0x190   :  { %245 = vst.msk [vmem:[%s577_s8 + $0x30] sm:$0xff] %vm238_vm2, %v226_v13 }
 0x196   :  { %v214_v14 = vpop.f32.mrf.mxu2 }
 0x197   :  { %v229_v15 = vpop.f32.mrf.mxu3  ;;  %241 = vst.msk [vmem:[%s577_s8 + $0x10] sm:$0xff] %vm238_vm2, %v214_v14 }
 0x198   :  { %246 = vst.msk [vmem:[%s577_s8 + $0x38] sm:$0xff] %vm238_vm2, %v229_v15 }
 0x19e   :  { %v217_v17 = vpop.f32.mrf.mxu2 }
 0x19f   :  { %v232_v18 = vpop.f32.mrf.mxu3  ;;  %242 = vst.msk [vmem:[%s577_s8 + $0x18] sm:$0xff] %vm238_vm2, %v217_v17 }
 0x1a0   :  { %247 = vst.msk [vmem:[%s577_s8 + $0x40] sm:$0xff] %vm238_vm2, %v232_v18 }
 0x1a6   :  { %v220_v19 = vpop.f32.mrf.mxu2 }
 0x1a7   :  { %v235_v20 = vpop.f32.mrf.mxu3  ;;  %243 = vst.msk [vmem:[%s577_s8 + $0x20] sm:$0xff] %vm238_vm2, %v220_v19 }
 0x1a8   :  { %248 = vst.msk [vmem:[%s577_s8 + $0x48] sm:$0xff] %vm238_vm2, %v235_v20 }
 0x1ae   :  { %v223_v22 = vpop.f32.mrf.mxu2 }
 0x1af   :  { %v276_v23 = vpop.f32.mrf.mxu3  ;;  %244 = vst.msk [vmem:[%s577_s8 + $0x28] sm:$0xff] %vm238_vm2, %v223_v22 }
 0x1b0   :  { %v277_v24 = vadd.f32 %v310_v21, %v276_v23 }
 0x1b2   :  { %311 = vtanh.f32 %v277_v24 }
 0x1b8   :  { %v312_v25 = vpop.eup %311 }
 0x1b9   :  { %281 = vst.msk [vmem:[%s578_s9] sm:$0xff] %vm280_vm3, %v312_v25 }

</bundles_post_ra>
